<compile_context>
chip_gen: v5e
topology: v5e:2x2
jax: 0.10.0
libtpu: 0.0.40
codegen_flags: <defaults>
</compile_context>

<pallas_src>
import functools

import jax
import jax.numpy as jnp
from jax.experimental import pallas as pl
from jax.experimental.pallas import tpu as pltpu


def _dueling_dqn_kernel(
    x_ref,               # [tile_b, input_dim] bf16
    w1_ref, b1_ref,      # feature 1: input_dim -> 256
    w2_ref, b2_ref,      # feature 2: 256 -> 128
    wh1_ref, bh1_ref,    # fused head layer 1: 128 -> 128  ([adv_hidden | val_hidden])
    wh2_ref, bh2_ref,    # fused head layer 2: 128 -> out_pad (adv in [0,A), value at A)
    out_ref,             # [tile_b, output_dim] f32
    *,
    output_dim,
):
    f32 = jnp.float32
    bf16 = jnp.bfloat16

    x = x_ref[...]  # already bf16 (cast once in the wrapper)

    # Feature trunk: ReLU(Linear) x 2. bf16 matmul inputs, f32 accumulate,
    # f32 elementwise (safe on v5e, which has no bf16 VPU).
    h = jnp.dot(x, w1_ref[...], preferred_element_type=f32) + b1_ref[...]
    h = jnp.maximum(h, 0.0)
    h = jnp.dot(h.astype(bf16), w2_ref[...], preferred_element_type=f32) + b2_ref[...]
    h = jnp.maximum(h, 0.0)

    # Fused head layer 1: one 128-lane matmul gives [adv_hidden | val_hidden].
    hv = jnp.dot(h.astype(bf16), wh1_ref[...], preferred_element_type=f32) + bh1_ref[...]
    hv = jnp.maximum(hv, 0.0)

    # Fused head layer 2 (block-diagonal weights): advantage in lanes [0, A),
    # state value in lane A, every other lane exactly zero (weights & bias are
    # zero there -> exact zeros in f32 accumulation).
    res = jnp.dot(hv.astype(bf16), wh2_ref[...], preferred_element_type=f32) + bh2_ref[...]

    val = res[:, output_dim:output_dim + 1]
    # Padded lanes are exact zeros, so the advantage sum is row_sum - value.
    adv_mean = (jnp.sum(res, axis=1, keepdims=True) - val) * (1.0 / output_dim)

    # True-width store: only the output_dim advantage lanes are written back.
    out_ref[...] = (res[:, :output_dim] + (val - adv_mean)).astype(out_ref.dtype)


def fuse_params(params, output_dim):
    """Fuse the advantage/value heads into 128-lane matmuls.

    Call ONCE (at init / after each weight update), not per forward: the
    concat / zeros / scatter ops would otherwise dominate small-batch calls.
    The zero padding of wh2/bh2 is a correctness invariant relied on by the
    kernel's adv_sum simplification.
    """
    bf16, f32 = jnp.bfloat16, jnp.float32
    out_pad = ((output_dim + 1 + 127) // 128) * 128

    wh1 = jnp.concatenate([params["wa1"], params["wv1"]], axis=1).astype(bf16)   # [128,128]
    bh1 = jnp.concatenate([params["ba1"], params["bv1"]], axis=1).astype(f32)    # [1,128]

    wh2 = jnp.zeros((128, out_pad), dtype=bf16)
    wh2 = wh2.at[:64, :output_dim].set(params["wa2"].astype(bf16))               # adv block
    wh2 = wh2.at[64:, output_dim].set(params["wv2"][:, 0].astype(bf16))          # value column
    bh2 = jnp.zeros((1, out_pad), dtype=f32)
    bh2 = bh2.at[:, :output_dim].set(params["ba2"].astype(f32))
    bh2 = bh2.at[:, output_dim].set(params["bv2"][0, 0].astype(f32))

    return {
        "w1": params["w1"].astype(bf16), "b1": params["b1"].astype(f32),
        "w2": params["w2"].astype(bf16), "b2": params["b2"].astype(f32),
        "wh1": wh1, "bh1": bh1, "wh2": wh2, "bh2": bh2,
    }


def _choose_tile_b(batch):
    if batch <= 8:
        return batch                         # single full-extent block (legal: == array dim)
    # >=2 grid steps for moderate batches (keeps both v7x TCs busy); cap at 512
    # (~85% of HBM roofline on v6e, VMEM stays tiny on every generation).
    half = -(-batch // 2)
    return min(512, ((half + 7) // 8) * 8)


def dueling_dqn_forward(x, fused, output_dim):
    """Forward matching torch DuelingDQN.forward: value + adv - adv.mean(dim=1)."""
    if x.ndim == 1:                          # mirror torch: x.unsqueeze(0)
        x = x[None, :]
    x = x.astype(jnp.bfloat16)               # MXU eats bf16; halves input DMA
    batch, input_dim = x.shape

    tile_b = _choose_tile_b(batch)
    grid = (pl.cdiv(batch, tile_b),)         # partial last block handled by Pallas masking

    def resident_spec(arr):
        # Grid-invariant whole-array block: DMA'd once, resident in VMEM.
        return pl.BlockSpec(arr.shape, lambda i: (0, 0))

    weight_args = (
        fused["w1"], fused["b1"],
        fused["w2"], fused["b2"],
        fused["wh1"], fused["bh1"],
        fused["wh2"], fused["bh2"],
    )
    in_specs = [pl.BlockSpec((tile_b, input_dim), lambda i: (i, 0))]
    in_specs += [resident_spec(a) for a in weight_args]

    kernel = functools.partial(_dueling_dqn_kernel, output_dim=output_dim)
    return pl.pallas_call(
        kernel,
        out_shape=jax.ShapeDtypeStruct((batch, output_dim), jnp.float32),
        grid=grid,
        in_specs=in_specs,
        out_specs=pl.BlockSpec((tile_b, output_dim), lambda i: (i, 0)),
        compiler_params=pltpu.CompilerParams(
            dimension_semantics=("parallel",)),   # batch tiles shard across v7x's 2 TCs
    )(x, *weight_args)


def init_params(key, input_dim, output_dim):
    """torch.nn.Linear-style init (uniform +/- 1/sqrt(fan_in)).

    Weights stored transposed to [in, out] in bf16; biases [1, out] in f32."""
    sizes = {
        "1": (input_dim, 256),
        "2": (256, 128),
        "a1": (128, 64),
        "a2": (64, output_dim),
        "v1": (128, 64),
        "v2": (64, 1),
    }
    params = {}
    for name, (fan_in, fan_out) in sizes.items():
        key, kw, kb = jax.random.split(key, 3)
        bound = 1.0 / jnp.sqrt(jnp.float32(fan_in))
        params["w" + name] = jax.random.uniform(
            kw, (fan_in, fan_out), jnp.float32, -bound, bound).astype(jnp.bfloat16)
        params["b" + name] = jax.random.uniform(
            kb, (1, fan_out), jnp.float32, -bound, bound)
    return params


def _reference_forward(x, p):
    """Pure-JAX reference with the same bf16-weight / f32-accumulate recipe."""
    if x.ndim == 1:
        x = x[None, :]

    def lin(h, w, b):
        return jnp.dot(h.astype(jnp.bfloat16), w,
                       preferred_element_type=jnp.float32) + b

    h = jnp.maximum(lin(x, p["w1"], p["b1"]), 0.0)
    h = jnp.maximum(lin(h, p["w2"], p["b2"]), 0.0)
    a = jnp.maximum(lin(h, p["wa1"], p["ba1"]), 0.0)
    adv = lin(a, p["wa2"], p["ba2"])
    v = jnp.maximum(lin(h, p["wv1"], p["bv1"]), 0.0)
    val = lin(v, p["wv2"], p["bv2"])
    return val + adv - jnp.mean(adv, axis=1, keepdims=True)


if __name__ == "__main__":
    key = jax.random.PRNGKey(0)
    input_dim, output_dim, batch = 16, 4, 2

    kx, kp = jax.random.split(key)
    x = jax.random.normal(kx, (batch, input_dim), dtype=jnp.float32)
    params = init_params(kp, input_dim, output_dim)
    fused = fuse_params(params, output_dim)      # hoisted out of the per-call hot path

    out = dueling_dqn_forward(x, fused, output_dim)
    out = jax.block_until_ready(out)

    ref = _reference_forward(x, params)
    assert out.shape == (batch, output_dim)
    assert jnp.allclose(out, ref, atol=1e-3, rtol=1e-3)

    print("KERNEL_OK")
</pallas_src>

<mosaic_0001>
module attributes {stable_mosaic.version = 11 : i64} {
  func.func @_dueling_dqn_kernel(%arg0: i32, %arg1: memref<2x16xbf16, #tpu.memory_space<vmem>>, %arg2: memref<16x256xbf16, #tpu.memory_space<vmem>>, %arg3: memref<1x256xf32, #tpu.memory_space<vmem>>, %arg4: memref<256x128xbf16, #tpu.memory_space<vmem>>, %arg5: memref<1x128xf32, #tpu.memory_space<vmem>>, %arg6: memref<128x128xbf16, #tpu.memory_space<vmem>>, %arg7: memref<1x128xf32, #tpu.memory_space<vmem>>, %arg8: memref<128x128xbf16, #tpu.memory_space<vmem>>, %arg9: memref<1x128xf32, #tpu.memory_space<vmem>>, %arg10: memref<2x4xf32, #tpu.memory_space<vmem>>) attributes {dimension_semantics = [#tpu.dimension_semantics<parallel>], iteration_bounds = array<i64: 1>, scalar_prefetch = 0 : i64, scratch_operands = 0 : i64, tpu.core_type = #tpu.core_type<tc>, window_params = [{transform_indices = @transform_0, window_bounds = array<i64: 2, 16>}, {pipeline_mode = #tpu.pipeline_mode<synchronous>, transform_indices = @transform_1, window_bounds = array<i64: 16, 256>}, {pipeline_mode = #tpu.pipeline_mode<synchronous>, transform_indices = @transform_2, window_bounds = array<i64: 1, 256>}, {pipeline_mode = #tpu.pipeline_mode<synchronous>, transform_indices = @transform_3, window_bounds = array<i64: 256, 128>}, {pipeline_mode = #tpu.pipeline_mode<synchronous>, transform_indices = @transform_4, window_bounds = array<i64: 1, 128>}, {pipeline_mode = #tpu.pipeline_mode<synchronous>, transform_indices = @transform_5, window_bounds = array<i64: 128, 128>}, {pipeline_mode = #tpu.pipeline_mode<synchronous>, transform_indices = @transform_6, window_bounds = array<i64: 1, 128>}, {pipeline_mode = #tpu.pipeline_mode<synchronous>, transform_indices = @transform_7, window_bounds = array<i64: 128, 128>}, {pipeline_mode = #tpu.pipeline_mode<synchronous>, transform_indices = @transform_8, window_bounds = array<i64: 1, 128>}, {transform_indices = @transform_9, window_bounds = array<i64: 2, 4>}]} {
    %c0 = arith.constant 0 : index
    %c0_0 = arith.constant 0 : index
    %0 = vector.load %arg1[%c0, %c0_0] : memref<2x16xbf16, #tpu.memory_space<vmem>>, vector<2x16xbf16>
    %c0_1 = arith.constant 0 : index
    %c0_2 = arith.constant 0 : index
    %1 = vector.load %arg2[%c0_1, %c0_2] : memref<16x256xbf16, #tpu.memory_space<vmem>>, vector<16x256xbf16>
    %cst = arith.constant dense<0.000000e+00> : vector<2x256xf32>
    %2 = tpu.matmul %0, %1, %cst {dimension_numbers = #tpu.dot_dimension_numbers<[1], [0], [0], [1], [0, 0, 1, 1], [], []>} : vector<2x16xbf16>, vector<16x256xbf16>, vector<2x256xf32> -> vector<2x256xf32>
    %c0_3 = arith.constant 0 : index
    %c0_4 = arith.constant 0 : index
    %3 = vector.load %arg3[%c0_3, %c0_4] : memref<1x256xf32, #tpu.memory_space<vmem>>, vector<1x256xf32>
    %4 = vector.broadcast %3 : vector<1x256xf32> to vector<2x256xf32>
    %5 = arith.addf %2, %4 : vector<2x256xf32>
    %cst_5 = arith.constant 0.000000e+00 : f32
    %6 = vector.broadcast %cst_5 : f32 to vector<2x256xf32>
    %7 = arith.maximumf %5, %6 : vector<2x256xf32>
    %8 = arith.truncf %7 : vector<2x256xf32> to vector<2x256xbf16>
    %c0_6 = arith.constant 0 : index
    %c0_7 = arith.constant 0 : index
    %9 = vector.load %arg4[%c0_6, %c0_7] : memref<256x128xbf16, #tpu.memory_space<vmem>>, vector<256x128xbf16>
    %cst_8 = arith.constant dense<0.000000e+00> : vector<2x128xf32>
    %10 = tpu.matmul %8, %9, %cst_8 {dimension_numbers = #tpu.dot_dimension_numbers<[1], [0], [0], [1], [0, 0, 1, 1], [], []>} : vector<2x256xbf16>, vector<256x128xbf16>, vector<2x128xf32> -> vector<2x128xf32>
    %c0_9 = arith.constant 0 : index
    %c0_10 = arith.constant 0 : index
    %11 = vector.load %arg5[%c0_9, %c0_10] : memref<1x128xf32, #tpu.memory_space<vmem>>, vector<1x128xf32>
    %12 = vector.broadcast %11 : vector<1x128xf32> to vector<2x128xf32>
    %13 = arith.addf %10, %12 : vector<2x128xf32>
    %cst_11 = arith.constant 0.000000e+00 : f32
    %14 = vector.broadcast %cst_11 : f32 to vector<2x128xf32>
    %15 = arith.maximumf %13, %14 : vector<2x128xf32>
    %16 = arith.truncf %15 : vector<2x128xf32> to vector<2x128xbf16>
    %c0_12 = arith.constant 0 : index
    %c0_13 = arith.constant 0 : index
    %17 = vector.load %arg6[%c0_12, %c0_13] : memref<128x128xbf16, #tpu.memory_space<vmem>>, vector<128x128xbf16>
    %cst_14 = arith.constant dense<0.000000e+00> : vector<2x128xf32>
    %18 = tpu.matmul %16, %17, %cst_14 {dimension_numbers = #tpu.dot_dimension_numbers<[1], [0], [0], [1], [0, 0, 1, 1], [], []>} : vector<2x128xbf16>, vector<128x128xbf16>, vector<2x128xf32> -> vector<2x128xf32>
    %c0_15 = arith.constant 0 : index
    %c0_16 = arith.constant 0 : index
    %19 = vector.load %arg7[%c0_15, %c0_16] : memref<1x128xf32, #tpu.memory_space<vmem>>, vector<1x128xf32>
    %20 = vector.broadcast %19 : vector<1x128xf32> to vector<2x128xf32>
    %21 = arith.addf %18, %20 : vector<2x128xf32>
    %cst_17 = arith.constant 0.000000e+00 : f32
    %22 = vector.broadcast %cst_17 : f32 to vector<2x128xf32>
    %23 = arith.maximumf %21, %22 : vector<2x128xf32>
    %24 = arith.truncf %23 : vector<2x128xf32> to vector<2x128xbf16>
    %c0_18 = arith.constant 0 : index
    %c0_19 = arith.constant 0 : index
    %25 = vector.load %arg8[%c0_18, %c0_19] : memref<128x128xbf16, #tpu.memory_space<vmem>>, vector<128x128xbf16>
    %cst_20 = arith.constant dense<0.000000e+00> : vector<2x128xf32>
    %26 = tpu.matmul %24, %25, %cst_20 {dimension_numbers = #tpu.dot_dimension_numbers<[1], [0], [0], [1], [0, 0, 1, 1], [], []>} : vector<2x128xbf16>, vector<128x128xbf16>, vector<2x128xf32> -> vector<2x128xf32>
    %c0_21 = arith.constant 0 : index
    %c0_22 = arith.constant 0 : index
    %27 = vector.load %arg9[%c0_21, %c0_22] : memref<1x128xf32, #tpu.memory_space<vmem>>, vector<1x128xf32>
    %28 = vector.broadcast %27 : vector<1x128xf32> to vector<2x128xf32>
    %29 = arith.addf %26, %28 : vector<2x128xf32>
    %30 = vector.extract_strided_slice %29 {offsets = [0, 4], sizes = [2, 1], strides = [1, 1]} : vector<2x128xf32> to vector<2x1xf32>
    %cst_23 = arith.constant dense<0.000000e+00> : vector<2xf32>
    %31 = vector.multi_reduction <add>, %29, %cst_23 [1] : vector<2x128xf32> to vector<2xf32>
    %32 = vector.shape_cast %31 : vector<2xf32> to vector<2x1xf32>
    %33 = arith.subf %32, %30 : vector<2x1xf32>
    %cst_24 = arith.constant 2.500000e-01 : f32
    %34 = vector.broadcast %cst_24 : f32 to vector<2x1xf32>
    %35 = arith.mulf %33, %34 : vector<2x1xf32>
    %36 = vector.extract_strided_slice %29 {offsets = [0, 0], sizes = [2, 4], strides = [1, 1]} : vector<2x128xf32> to vector<2x4xf32>
    %37 = arith.subf %30, %35 : vector<2x1xf32>
    %38 = vector.broadcast %37 : vector<2x1xf32> to vector<2x4xf32>
    %39 = arith.addf %36, %38 : vector<2x4xf32>
    %c0_25 = arith.constant 0 : index
    %c0_26 = arith.constant 0 : index
    %40 = vector.load %arg10[%c0_25, %c0_26] : memref<2x4xf32, #tpu.memory_space<vmem>>, vector<2x4xf32>
    tpu.vector_store %arg10[%c0_25, %c0_26], %39 {strides = array<i32>} : memref<2x4xf32, #tpu.memory_space<vmem>>, vector<2x4xf32>,
    return
  }
  func.func @transform_0(%arg0: i32) -> (i32, i32) {
    %c0_i32 = arith.constant 0 : i32
    %c0_i32_0 = arith.constant 0 : i32
    return %arg0, %c0_i32 : i32, i32
  }
  func.func @transform_1(%arg0: i32) -> (i32, i32) {
    %c0_i32 = arith.constant 0 : i32
    %c0_i32_0 = arith.constant 0 : i32
    %c0_i32_1 = arith.constant 0 : i32
    return %c0_i32, %c0_i32_0 : i32, i32
  }
  func.func @transform_2(%arg0: i32) -> (i32, i32) {
    %c0_i32 = arith.constant 0 : i32
    %c0_i32_0 = arith.constant 0 : i32
    %c0_i32_1 = arith.constant 0 : i32
    return %c0_i32, %c0_i32_0 : i32, i32
  }
  func.func @transform_3(%arg0: i32) -> (i32, i32) {
    %c0_i32 = arith.constant 0 : i32
    %c0_i32_0 = arith.constant 0 : i32
    %c0_i32_1 = arith.constant 0 : i32
    return %c0_i32, %c0_i32_0 : i32, i32
  }
  func.func @transform_4(%arg0: i32) -> (i32, i32) {
    %c0_i32 = arith.constant 0 : i32
    %c0_i32_0 = arith.constant 0 : i32
    %c0_i32_1 = arith.constant 0 : i32
    return %c0_i32, %c0_i32_0 : i32, i32
  }
  func.func @transform_5(%arg0: i32) -> (i32, i32) {
    %c0_i32 = arith.constant 0 : i32
    %c0_i32_0 = arith.constant 0 : i32
    %c0_i32_1 = arith.constant 0 : i32
    return %c0_i32, %c0_i32_0 : i32, i32
  }
  func.func @transform_6(%arg0: i32) -> (i32, i32) {
    %c0_i32 = arith.constant 0 : i32
    %c0_i32_0 = arith.constant 0 : i32
    %c0_i32_1 = arith.constant 0 : i32
    return %c0_i32, %c0_i32_0 : i32, i32
  }
  func.func @transform_7(%arg0: i32) -> (i32, i32) {
    %c0_i32 = arith.constant 0 : i32
    %c0_i32_0 = arith.constant 0 : i32
    %c0_i32_1 = arith.constant 0 : i32
    return %c0_i32, %c0_i32_0 : i32, i32
  }
  func.func @transform_8(%arg0: i32) -> (i32, i32) {
    %c0_i32 = arith.constant 0 : i32
    %c0_i32_0 = arith.constant 0 : i32
    %c0_i32_1 = arith.constant 0 : i32
    return %c0_i32, %c0_i32_0 : i32, i32
  }
  func.func @transform_9(%arg0: i32) -> (i32, i32) {
    %c0_i32 = arith.constant 0 : i32
    %c0_i32_0 = arith.constant 0 : i32
    return %arg0, %c0_i32 : i32, i32
  }
}

</mosaic_0001>

<bundles_post_ra>
// kernel: tpu_custom_call.1
= control target key start
LH: loop header
LB: loop body
LE: loop exit
PB: predicated region body
PF: predicated region fallthrough
CT: control target
= control target key end

     0   :  { %14 = vsyncpa [#allocation3], 0  ;;  %s994_s0 = inlined_call_operand.hbm [shape: bf16[2,16], index: 0, kind: input, shape index: {}]   ;;  %s995_s1 = inlined_call_operand.hbm [shape: bf16[16,256], index: 1, kind: input, shape index: {}]   ;;  %s996_s2 = inlined_call_operand.hbm [shape: f32[1,256], index: 2, kind: input, shape index: {}]   ;;  %s997_s3 = inlined_call_operand.hbm [shape: bf16[256,128], index: 3, kind: input, shape index: {}]   ;;  %s998_s4 = inlined_call_operand.vmem [shape: f32[1,128], index: 4, kind: input, shape index: {}]   ;;  %s999_s5 = inlined_call_operand.hbm [shape: bf16[128,128], index: 5, kind: input, shape index: {}]   ;;  %s1000_s6 = inlined_call_operand.vmem [shape: f32[1,128], index: 6, kind: input, shape index: {}]   ;;  %s1001_s7 = inlined_call_operand.hbm [shape: bf16[128,128], index: 7, kind: input, shape index: {}]   ;;  %s1002_s8 = inlined_call_operand.vmem [shape: f32[1,128], index: 8, kind: input, shape index: {}]   ;;  %s1003_s9 = inlined_call_operand.hbm [shape: f32[2,4], index: 9, kind: output, shape index: {}]  }
   0x1   :  { %15 = vsyncpa [#allocation6], 0 }
   0x2   :  { %16 = vsyncpa [#allocation9], 0 }
   0x3   :  { %17 = vsyncpa [#allocation12], 0  ;;  %s34_s11 = sshll.u32 %s995_s1, 4  ;;  %s35_s11 = int_to_ptr.hbm [resolvable:$true] %s34_s11 }
   0x4   :  { %18 = vsyncpa [#allocation4], 0  ;;  %s902_s12 = smov [#allocation5]   ;;  %s58_s16 = sshll.u32 %s997_s3, 4  ;;  %s59_s16 = int_to_ptr.hbm [resolvable:$true] %s58_s16 }
   0x5   :  { %s36_s13 = sshll.u32 %s902_s12, 4  ;;  %s903_s17 = smov 128   ;;  %s37_s13 = int_to_ptr.vmem [resolvable:$true] %s36_s13 }
   0x6   :  { %s904_s18 = smov 8   ;;  %s905_s19 = smov [#allocation8]  }
   0x7   :  { %42 = dma.hbm_to_vmem [thread:$0]  %s35_s11, 256, %s37_s13, [#allocation6], %s903_s17, %s903_s17, %s904_s18  }
   0x8   :  { %s60_s20 = sshll.u32 %s905_s19, 4  ;;  %s906_s21 = smov 64   ;;  %s61_s20 = int_to_ptr.vmem [resolvable:$true] %s60_s20 }
   0x9   :  { %s907_s22 = smov 4   ;;  %s24_s24 = sshll.u32 %s994_s0, 4  ;;  %s25_s24 = int_to_ptr.hbm [resolvable:$true] %s24_s24 }
   0xa   :  { %66 = dma.hbm_to_vmem [thread:$0]  %s59_s16, 2048, %s61_s20, [#allocation9], %s906_s21, %s906_s21, %s907_s22  }
   0xb   :  { %s908_s25 = smov [#allocation2]   ;;  %s48_s28 = sshll.u32 %s996_s2, 4  ;;  %s49_s28 = int_to_ptr.hbm [resolvable:$true] %s48_s28 }
   0xc   :  { %s26_s26 = sshll.u32 %s908_s25, 4  ;;  %s909_s29 = smov [#allocation7]   ;;  %s27_s26 = int_to_ptr.vmem [resolvable:$true] %s26_s26 }
   0xd   :  { %29 = dma.hbm_to_vmem [thread:$0]  %s25_s24, 16, %s27_s26, [#allocation3]  }
   0xe   :  { %s50_s30 = sshll.u32 %s909_s29, 4  ;;  %s73_s12 = sshll.u32 %s999_s5, 4  ;;  %s51_s30 = int_to_ptr.vmem [resolvable:$true] %s50_s30  ;;  %s74_s12 = int_to_ptr.hbm [resolvable:$true] %s73_s12 }
   0xf   :  { %53 = dma.hbm_to_vmem [thread:$0]  %s49_s28, 32, %s51_s30, [#allocation6]  }
  0x10   :  { %s88_s14 = sshll.u32 %s1001_s7, 4  ;;  %s910_s15 = smov [#allocation10]   ;;  %s89_s14 = int_to_ptr.hbm [resolvable:$true] %s88_s14 }
  0x11   :  { %s75_s16 = sshll.u32 %s910_s15, 4  ;;  %s911_s2 = smov [#allocation11]   ;;  %s76_s16 = int_to_ptr.vmem [resolvable:$true] %s75_s16 }
  0x12   :  { %81 = dma.hbm_to_vmem [thread:$0]  %s74_s12, 1024, %s76_s16, [#allocation9], %s906_s21, %s906_s21, %s907_s22  }
  0x13   :  { %s90_s17 = sshll.u32 %s911_s2, 4  ;;  %s91_s17 = int_to_ptr.vmem [resolvable:$true] %s90_s17 }
  0x14   :  { %96 = dma.hbm_to_vmem [thread:$0]  %s89_s14, 1024, %s91_s17, [#allocation12], %s906_s21, %s906_s21, %s907_s22  }
  0x15   :  { %892 = dma.done.wait [#allocation3], 16  }
  0x16   :  { %893 = vsyncadd [#allocation3], 4294967280 }
  0x17   :  { %894 = dma.done.wait [#allocation6], 288  }
  0x18   :  { %895 = vsyncadd [#allocation6], 4294967008 }
  0x19   :  { %896 = dma.done.wait [#allocation9], 3072  }
  0x1a   :  { %897 = vsyncadd [#allocation9], 4294964224 }
  0x1b   :  { %898 = dma.done.wait [#allocation12], 1024  }
  0x1c   :  { %899 = vsyncadd [#allocation12], 4294966272  ;;  %v538_v0 = vld [vmem:[#allocation5] sm:$0xf]  ;;  %v675_v1 = vld [vmem:[#allocation5 + $0x4] sm:$0xf0] }
  0x1d   :  { %v674_v2 = vld [vmem:[#allocation5 + $0x4] sm:$0xf]  ;;  %v539_v3 = vor.u32 %v675_v1, %v538_v0  ;;  %v540_v4 = vld [vmem:[#allocation5 + $0x8] sm:$0xf0]  ;;  %v124_v8 = vld [vmem:[#allocation2] sm:$0x1] }
  0x1e   :  { %v683_v5 = vld [vmem:[#allocation8 + $0x38] sm:$0xff]  ;;  %v543_v6 = vor.u32 %v674_v2, %v540_v4  ;;  %vm143_vm0 = vcmask 130048   ;;  %v682_v9 = vld [vmem:[#allocation8 + $0x30] sm:$0xff]  ;;  %v681_v11 = vld [vmem:[#allocation8 + $0x28] sm:$0xff]  ;;  %vm501_vm1 = vcmask 1041408   ;;  %s523_s23 = sshll.u32 %s1003_s9, 4  ;;  %s524_s23 = int_to_ptr.hbm [resolvable:$true] %s523_s23 }
  0x1f   :  { %v691_v7 = vld [vmem:[#allocation8 + $0x78] sm:$0xff]  ;;  %154 = vmatpush.bf16.msra.mxu0 %v539_v3  ;;  %309 = vmatpush.bf16.msra.mxu2 %v683_v5  ;;  %v690_v10 = vld [vmem:[#allocation8 + $0x70] sm:$0xff]  ;;  %v689_v12 = vld [vmem:[#allocation8 + $0x68] sm:$0xff]  ;;  %vm514_vm2 = vcmask 25600  }
  0x20   :  { %167 = vmatpush.bf16.msra.mxu1 %v543_v6  ;;  %322 = vmatpush.bf16.msra.mxu3 %v691_v7  ;;  %v680_v13 = vld [vmem:[#allocation8 + $0x20] sm:$0xff]  ;;  %v679_v15 = vld [vmem:[#allocation8 + $0x18] sm:$0xff]  ;;  %v678_v17 = vld [vmem:[#allocation8 + $0x10] sm:$0xff] }
  0x21   :  { %v688_v14 = vld [vmem:[#allocation8 + $0x60] sm:$0xff]  ;;  %v687_v16 = vld [vmem:[#allocation8 + $0x58] sm:$0xff]  ;;  %v686_v18 = vld [vmem:[#allocation8 + $0x50] sm:$0xff] }
  0x22   :  { %544 = vmatmul.msk.bf16.vlgmr.msra.gmra.mxu0 %vm143_vm0, %v124_v8  ;;  %v677_v19 = vld [vmem:[#allocation8 + $0x8] sm:$0xff]  ;;  %v676_v21 = vld [vmem:[#allocation8] sm:$0xff]  ;;  %v699_v23 = vld [vmem:[#allocation10 + $0x38] sm:$0xff] }
  0x23   :  { %545 = vmatmul.msk.bf16.vlgmr.msra.gmra.mxu1 %vm143_vm0, %v124_v8  ;;  %310 = vmatpush.bf16.msra.mxu2 %v682_v9  ;;  %v685_v20 = vld [vmem:[#allocation8 + $0x48] sm:$0xff]  ;;  %v684_v22 = vld [vmem:[#allocation8 + $0x40] sm:$0xff]  ;;  %v698_v24 = vld [vmem:[#allocation10 + $0x30] sm:$0xff]  ;;  %v912_v8 = vmov 4  }
  0x24   :  { %323 = vmatpush.bf16.msra.mxu3 %v690_v10  ;;  %405 = vmatpush.bf16.msrb.mxu0 %v699_v23  ;;  %v697_v25 = vld [vmem:[#allocation10 + $0x28] sm:$0xff]  ;;  %v696_v26 = vld [vmem:[#allocation10 + $0x20] sm:$0xff]  ;;  %v695_v27 = vld [vmem:[#allocation10 + $0x18] sm:$0xff] }
  0x25   :  { %v127_v28 = vld [vmem:[#allocation7] sm:$0x3]  ;;  %v694_v29 = vld [vmem:[#allocation10 + $0x10] sm:$0xff]  ;;  %v693_v42 = vld [vmem:[#allocation10 + $0x8] sm:$0xff]  ;;  %720 = vset.pattern.permute.xlu0 %v912_v8 }
  0x26   :  { %v129_v30 = vperm.slane %v127_v28, 0  ;;  %v130_v31 = vperm.slane %v127_v28, 1  ;;  %v692_v43 = vld [vmem:[#allocation10] sm:$0xff]  ;;  %v707_v44 = vld [vmem:[#allocation11 + $0x38] sm:$0xff]  ;;  %v706_v45 = vld [vmem:[#allocation11 + $0x30] sm:$0xff] }
  0x27   :  { %311 = vmatpush.bf16.msra.mxu2 %v681_v11  ;;  %488 = vmatpush.bf16.msrb.mxu1 %v707_v44  ;;  %v705_v46 = vld [vmem:[#allocation11 + $0x28] sm:$0xff]  ;;  %v704_v47 = vld [vmem:[#allocation11 + $0x20] sm:$0xff]  ;;  %v703_v48 = vld [vmem:[#allocation11 + $0x18] sm:$0xff] }
  0x28   :  { %324 = vmatpush.bf16.msra.mxu3 %v689_v12  ;;  %406 = vmatpush.bf16.msrb.mxu0 %v698_v24  ;;  %v702_v49 = vld [vmem:[#allocation11 + $0x10] sm:$0xff]  ;;  %v721_v50 = vld [vmem:[%s998_s4] ss:$0 sm:$0xff]  ;;  %v700_v60 = vld [vmem:[#allocation11] sm:$0xff] }
  0x29   :  { %v701_v59 = vld [vmem:[#allocation11 + $0x8] sm:$0xff] }
  0x2a   :  { %v722_v61 = vld [vmem:[%s1000_s6] ss:$0 sm:$0xff]  ;;  %s913_s6 = smov [#allocation13]  }
  0x2b   :  { %312 = vmatpush.bf16.msra.mxu2 %v680_v13  ;;  %489 = vmatpush.bf16.msrb.mxu1 %v706_v45  ;;  %v723_v3 = vld [vmem:[%s1002_s8] ss:$0 sm:$0xff]  ;;  %s521_s21 = sshll.u32 %s913_s6, 4  ;;  %s522_s21 = int_to_ptr.vmem [resolvable:$true] %s521_s21 }
  0x2c   :  { %325 = vmatpush.bf16.msra.mxu3 %v688_v14  ;;  %407 = vmatpush.bf16.msrb.mxu0 %v697_v25 }
  0x2f   :  { %313 = vmatpush.bf16.msra.mxu2 %v679_v15  ;;  %490 = vmatpush.bf16.msrb.mxu1 %v705_v46 }
  0x30   :  { %326 = vmatpush.bf16.msra.mxu3 %v687_v16  ;;  %408 = vmatpush.bf16.msrb.mxu0 %v696_v26 }
  0x33   :  { %314 = vmatpush.bf16.msra.mxu2 %v678_v17  ;;  %491 = vmatpush.bf16.msrb.mxu1 %v704_v47 }
  0x34   :  { %327 = vmatpush.bf16.msra.mxu3 %v686_v18  ;;  %409 = vmatpush.bf16.msrb.mxu0 %v695_v27 }
  0x37   :  { %315 = vmatpush.bf16.msra.mxu2 %v677_v19  ;;  %492 = vmatpush.bf16.msrb.mxu1 %v703_v48 }
  0x38   :  { %328 = vmatpush.bf16.msra.mxu3 %v685_v20  ;;  %410 = vmatpush.bf16.msrb.mxu0 %v694_v29 }
  0x3b   :  { %316 = vmatpush.bf16.msra.mxu2 %v676_v21  ;;  %493 = vmatpush.bf16.msrb.mxu1 %v702_v49 }
  0x3c   :  { %329 = vmatpush.bf16.msra.mxu3 %v684_v22  ;;  %411 = vmatpush.bf16.msrb.mxu0 %v693_v42 }
  0x3f   :  { %494 = vmatpush.bf16.msrb.mxu1 %v701_v59 }
  0x40   :  { %412 = vmatpush.bf16.msrb.mxu0 %v692_v43 }
  0x43   :  { %495 = vmatpush.bf16.msrb.mxu1 %v700_v60 }
  0x9f   :  { %v156_v32 = vpop.f32.mrf.mxu0 }
  0xa0   :  { %v157_v33 = vadd.f32 %v156_v32, %v129_v30  ;;  %v169_v34 = vpop.f32.mrf.mxu1 }
  0xa1   :  { %v170_v35 = vadd.f32 %v169_v34, %v130_v31 }
  0xa2   :  { %v173_v36 = vmax.f32 %v157_v33, 0.0 }
  0xa3   :  { %v174_v37 = vmax.f32 %v170_v35, 0.0 }
  0xa4   :  { %v175_v38 = vpack.c.bf16 %v173_v36, %v173_v36 }
  0xa5   :  { %v176_v39 = vpack.c.bf16 %v174_v37, %v174_v37 }
  0xa6   :  { %317 = vmatmul.bf16.vlgmr.msra.gmra.mxu2 %v175_v38 }
  0xa7   :  { %330 = vmatmul.bf16.vlgmr.msra.gmra.mxu3 %v176_v39  ;;  %v158_v40 = vpop.f32.mrf.mxu0 }
  0xa8   :  { %v171_v41 = vpop.f32.mrf.mxu1 }
 0x129   :  { %v318_v51 = vpop.f32.mrf.mxu2 }
 0x12a   :  { %v319_v52 = vadd.f32 %v721_v50, %v318_v51  ;;  %v331_v53 = vpop.f32.mrf.mxu3 }
 0x12c   :  { %v332_v54 = vadd.f32 %v331_v53, %v319_v52 }
 0x12e   :  { %v335_v55 = vmax.f32 %v332_v54, 0.0 }
 0x130   :  { %v336_v56 = vpack.c.bf16 %v335_v55, %v335_v55 }
 0x131   :  { %v320_v57 = vpop.f32.mrf.mxu2 }
 0x132   :  { %v333_v58 = vpop.f32.mrf.mxu3  ;;  %413 = vmatmul.bf16.vlgmr.msrb.gmra.mxu0 %v336_v56 }
 0x1af   :  { %v414_v62 = vpop.f32.mrf.mxu0 }
 0x1b0   :  { %v415_v63 = vadd.f32 %v722_v61, %v414_v62 }
 0x1b2   :  { %v418_v0 = vmax.f32 %v415_v63, 0.0 }
 0x1b4   :  { %v419_v1 = vpack.c.bf16 %v418_v0, %v418_v0 }
 0x1b6   :  { %496 = vmatmul.bf16.vlgmr.msrb.gmra.mxu1 %v419_v1 }
 0x1b7   :  { %v416_v2 = vpop.f32.mrf.mxu0 }
 0x233   :  { %v497_v4 = vpop.f32.mrf.mxu1 }
 0x234   :  { %v498_v5 = vadd.f32 %v723_v3, %v497_v4 }
 0x236   :  { %v502_v6 = vsel %vm501_vm1, %v498_v5, 0.0 }
 0x237   :  { %503 = vadd.xlane.f32.xlu0 %v502_v6 }
 0x23b   :  { %v499_v7 = vpop.f32.mrf.mxu1 }
 0x2aa   :  { %v504_v9 = vpop.xlane.xlu0 %503 }
 0x2ab   :  { %v505_v10 = vsub.f32 %v504_v9, %v498_v5 }
 0x2ad   :  { %v506_v11 = vmul.f32 0.25, %v505_v10 }
 0x2af   :  { %v507_v12 = vsub.f32 %v498_v5, %v506_v11 }
 0x2b1   :  { %510 = vperm.xlu0 %720, %v507_v12  }
 0x323   :  { %v511_v13 = vpop.permute.xlu0 %510 }
 0x324   :  { %v513_v14 = vadd.f32 %v511_v13, %v498_v5 }
 0x326   :  { %515 = vst.msk [vmem:[#allocation13] sm:$0x3] %vm514_vm2, %v513_v14 }
 0x327   :  { %526 = dma.vmem_to_hbm [thread:$0]  %s522_s21, 32, %s524_s23, [#allocation4]  }
 0x328   :  { %900 = dma.done.wait [#allocation4], 32  }
 0x329   :  { %901 = vsyncadd [#allocation4], 4294967264 }
 0x32a   :  { %531 = vsyncpa [#allocation3], 1 }
 0x32b   :  { %532 = vsyncpa [#allocation6], 1 }
 0x32c   :  { %533 = vsyncpa [#allocation9], 1 }
 0x32d   :  { %534 = vsyncpa [#allocation12], 1 }
 0x32e   :  { %535 = vsyncpa [#allocation4], 1 }

</bundles_post_ra>
